<compile_context>
chip_gen: v7x
topology: tpu7x:2x2x1
jax: 0.10.0
libtpu: 0.0.40
codegen_flags: <defaults>
</compile_context>

<pallas_src>
import functools

import jax
import jax.numpy as jnp
from jax.experimental import pallas as pl
from jax.experimental.pallas import tpu as pltpu

# bf16 feeds the MXU at full rate on v5e/v6e/v7x (accumulation is f32 via
# preferred_element_type).  Set to jnp.float32 for bit-exact parity with the
# PyTorch f32 reference.
MXU_INPUT_DTYPE = jnp.bfloat16

_DN_CONTRACT_LAST = (((1,), (1,)), ((), ()))   # x[..., K] . w[..., K]  ==  x @ w.T


def _default_vmem_limit_bytes():
    """Generation-aware scoped-VMEM limit (v7x: ~48 MiB, v5e/v6e: ~100 MiB)."""
    try:
        info = pltpu.get_tpu_info()
        phys = getattr(info, "vmem_capacity_bytes", None)
        if phys:
            return int(min(phys - (16 << 20), 100 << 20))
    except Exception:
        pass
    return 48 << 20   # safe on all of v5e / v6e / v7x


_VMEM_LIMIT_BYTES = _default_vmem_limit_bytes()


def _pick_row_tile(n, max_tile=512):
    """Largest row tile <= max_tile that divides n (multiple of 32), else n."""
    if n <= max_tile:
        return n
    t = (max_tile // 32) * 32
    while t >= 32:
        if n % t == 0:
            return t
        t -= 32
    return n


def _pick_q_tile(L, max_tile=128):
    """Query-row tile: full L if small, else a multiple-of-128 divisor of L."""
    if L <= max_tile:
        return L
    t = (max_tile // 128) * 128
    while t >= 128:
        if L % t == 0:
            return t
        t -= 128
    return L


# ----------------------------------------------------------------------------
# Kernel 1: fused q/k/v projection (one wide matmul; head-major bf16 outputs).
#   x read from HBM once per row tile; fused weight slab stays VMEM-resident.
# ----------------------------------------------------------------------------
def _qkv_proj_kernel(x_ref, w_ref, q_ref, k_ref, v_ref, *, n_head, d_k, d_v):
    x = x_ref[...].astype(w_ref.dtype)                        # (tn, d_model)
    y = jax.lax.dot_general(                                   # (tn, 2*H*d_k + H*d_v)
        x, w_ref[...], dimension_numbers=_DN_CONTRACT_LAST,
        preferred_element_type=jnp.float32)
    hdk = n_head * d_k
    # head-major stores: each head's tile is a contiguous (tn, d) block
    for h in range(n_head):
        q_ref[h] = y[:, h * d_k:(h + 1) * d_k].astype(q_ref.dtype)
        k_ref[h] = y[:, hdk + h * d_k:hdk + (h + 1) * d_k].astype(k_ref.dtype)
        v_ref[h] = y[:, 2 * hdk + h * d_v:2 * hdk + (h + 1) * d_v].astype(v_ref.dtype)


def qkv_projection_headmajor(x, w_all, *, n_head, d_k, d_v, out_dtype,
                             max_row_tile=512):
    N, d_model = x.shape
    d_total = w_all.shape[0]
    tn = _pick_row_tile(N, max_row_tile)
    kern = functools.partial(_qkv_proj_kernel, n_head=n_head, d_k=d_k, d_v=d_v)
    return pl.pallas_call(
        kern,
        out_shape=(jax.ShapeDtypeStruct((n_head, N, d_k), out_dtype),
                   jax.ShapeDtypeStruct((n_head, N, d_k), out_dtype),
                   jax.ShapeDtypeStruct((n_head, N, d_v), out_dtype)),
        grid=(N // tn,),
        in_specs=[pl.BlockSpec((tn, d_model), lambda i: (i, 0)),
                  pl.BlockSpec((d_total, d_model), lambda i: (0, 0))],
        out_specs=(pl.BlockSpec((n_head, tn, d_k), lambda i: (0, i, 0)),
                   pl.BlockSpec((n_head, tn, d_k), lambda i: (0, i, 0)),
                   pl.BlockSpec((n_head, tn, d_v), lambda i: (0, i, 0))),
        compiler_params=pltpu.CompilerParams(
            dimension_semantics=("parallel",),
            vmem_limit_bytes=_VMEM_LIMIT_BYTES),
    )(x, w_all)


# ----------------------------------------------------------------------------
# Kernel 2: sparse (top-k masked) attention + fc + residual + LayerNorm, fused.
#   Grid (B, L//tq, H); head axis is innermost and accumulates the fc output,
#   so the merged-head context never touches HBM.
# ----------------------------------------------------------------------------
def _kth_largest_per_row(scores, top_k):
    """Exact k-th largest value per row (duplicates counted) — torch.topk semantics.

    Iterates over at most `top_k` *distinct* values (row max + removal),
    accumulating multiplicities -> O(top_k * tq * L).  The equality compare is
    computed once per iteration and reused for both the count and the removal.
    """
    rows = scores.shape[0]
    work = scores
    kth = jnp.full((rows, 1), -jnp.inf, dtype=jnp.float32)
    found = jnp.zeros((rows, 1), dtype=jnp.bool_)
    cum = jnp.zeros((rows, 1), dtype=jnp.float32)
    for _ in range(top_k):
        cur = jnp.max(work, axis=-1, keepdims=True)                      # (rows,1)
        eq = work == cur                                                 # reuse below
        cnt = jnp.sum(eq.astype(jnp.float32), axis=-1, keepdims=True)
        cum = cum + cnt
        newly = jnp.logical_and(jnp.logical_not(found), cum >= jnp.float32(top_k))
        kth = jnp.where(newly, cur, kth)
        found = jnp.logical_or(found, newly)
        work = jnp.where(eq, -jnp.inf, work)                             # drop value
    return kth


def _attn_fc_ln_kernel(q_ref, k_ref, v_ref, res_ref, wfc_ref, g_ref, b_ref,
                       out_ref, attn_ref, mask_ref, acc_ref,
                       *, top_k, inv_scale, eps):
    h = pl.program_id(2)

    @pl.when(h == 0)
    def _():
        acc_ref[...] = jnp.zeros_like(acc_ref)

    q = q_ref[0, 0]                                    # (tq, d_k)  compute dtype
    k = k_ref[0, 0]                                    # (L,  d_k)
    v = v_ref[0, 0]                                    # (L,  d_v)

    # pre-scale q (L*d_k muls) instead of dividing the (tq, L) scores
    qs = q * inv_scale                                 # weak-typed -> stays in q dtype

    scores = jax.lax.dot_general(                      # (tq, L) f32
        qs, k, dimension_numbers=_DN_CONTRACT_LAST,
        preferred_element_type=jnp.float32)

    kth = _kth_largest_per_row(scores, top_k)
    mask = scores < kth                                # torch: lt(scores, vk)
    masked = jnp.where(mask, jnp.float32(-1e18), scores)

    m = jnp.max(masked, axis=-1, keepdims=True)        # f32 softmax
    p = jnp.exp(masked - m)
    s = jnp.sum(p, axis=-1, keepdims=True)
    attn = p * pl.reciprocal(s, approx=True)           # EUP slot (otherwise idle)

    attn_ref[0, 0] = attn.astype(attn_ref.dtype)
    mask_ref[0, 0] = mask.astype(mask_ref.dtype)

    ctx = jnp.dot(attn.astype(q.dtype), v,             # (tq, d_v)
                  preferred_element_type=jnp.float32)
    # per-head fc partial sum:  ctx_h @ w_fc_h   (w_fc_h is (d_v, d_model))
    acc_ref[...] += jnp.dot(ctx.astype(q.dtype), wfc_ref[0],
                            preferred_element_type=jnp.float32)

    @pl.when(h == pl.num_programs(2) - 1)
    def _():
        # dropout == identity (inference); residual add + LayerNorm(eps)
        y = acc_ref[...] + res_ref[0].astype(jnp.float32)
        mean = jnp.mean(y, axis=-1, keepdims=True)
        d = y - mean
        var = jnp.mean(d * d, axis=-1, keepdims=True)   # biased, like nn.LayerNorm
        yn = d * jax.lax.rsqrt(var + jnp.float32(eps))
        out_ref[0] = (yn * g_ref[...] + b_ref[...]).astype(out_ref.dtype)


def sparse_attn_fc_ln(q, k, v, residual, w_fc_heads, gamma, beta,
                      *, top_k, scale, eps=1e-6, max_q_tile=128):
    # q/k: [H, B, L, d_k], v: [H, B, L, d_v], residual: [B, L, d_model]
    H, B, L, d_k = q.shape
    d_v = v.shape[-1]
    d_model = residual.shape[-1]
    tq = _pick_q_tile(L, max_q_tile)
    n_q = L // tq

    g2 = gamma.reshape(1, d_model).astype(jnp.float32)
    b2 = beta.reshape(1, d_model).astype(jnp.float32)

    kern = functools.partial(_attn_fc_ln_kernel, top_k=top_k,
                             inv_scale=float(1.0 / scale), eps=eps)
    return pl.pallas_call(
        kern,
        out_shape=(jax.ShapeDtypeStruct((B, L, d_model), jnp.float32),
                   jax.ShapeDtypeStruct((B, H, L, L), jnp.float32),
                   jax.ShapeDtypeStruct((B, H, L, L), jnp.int8)),
        grid=(B, n_q, H),
        in_specs=[pl.BlockSpec((1, 1, tq, d_k), lambda b, i, h: (h, b, i, 0)),
                  pl.BlockSpec((1, 1, L, d_k), lambda b, i, h: (h, b, 0, 0)),
                  pl.BlockSpec((1, 1, L, d_v), lambda b, i, h: (h, b, 0, 0)),
                  pl.BlockSpec((1, tq, d_model), lambda b, i, h: (b, i, 0)),
                  pl.BlockSpec((1, d_v, d_model), lambda b, i, h: (h, 0, 0)),
                  pl.BlockSpec((1, d_model), lambda b, i, h: (0, 0)),
                  pl.BlockSpec((1, d_model), lambda b, i, h: (0, 0))],
        out_specs=(pl.BlockSpec((1, tq, d_model), lambda b, i, h: (b, i, 0)),
                   pl.BlockSpec((1, 1, tq, L), lambda b, i, h: (b, h, i, 0)),
                   pl.BlockSpec((1, 1, tq, L), lambda b, i, h: (b, h, i, 0))),
        scratch_shapes=[pltpu.VMEM((tq, d_model), jnp.float32)],
        compiler_params=pltpu.CompilerParams(
            dimension_semantics=("parallel", "parallel", "arbitrary"),
            vmem_limit_bytes=_VMEM_LIMIT_BYTES),
    )(q, k, v, residual, w_fc_heads, g2, b2)


# ----------------------------------------------------------------------------
# EncoderLayer forward (glue in plain JAX; hot paths in the two kernels above)
# ----------------------------------------------------------------------------
def encoder_layer_forward(enc_input, params, *, n_head, d_k, d_v, top_k):
    B, L, d_model = enc_input.shape
    N = B * L
    x2 = enc_input.reshape(N, d_model)

    compute_dtype = MXU_INPUT_DTYPE
    # fuse the three projection weights into one slab (pre-cast to MXU dtype)
    w_all = jnp.concatenate(
        [params["w_qs"], params["w_ks"], params["w_vs"]], axis=0
    ).astype(compute_dtype)

    qh, kh, vh = qkv_projection_headmajor(
        x2, w_all, n_head=n_head, d_k=d_k, d_v=d_v, out_dtype=compute_dtype)
    qh = qh.reshape(n_head, B, L, d_k)       # layout-free reshapes
    kh = kh.reshape(n_head, B, L, d_k)
    vh = vh.reshape(n_head, B, L, d_v)

    # w_fc [d_model, H*d_v] -> per-head (H, d_v, d_model) so the fused epilogue
    # matmul needs no in-kernel transpose/slicing (one-time param prep).
    w_fc_heads = params["w_fc"].reshape(d_model, n_head, d_v)
    w_fc_heads = jnp.transpose(w_fc_heads, (1, 2, 0)).astype(compute_dtype)

    # reference clamps top_k to key.size(-1) == d_k; also clamp to L (torch.topk
    # would raise for top_k > L).
    top_k_eff = min(top_k, d_k, L)
    scale = float(d_k) ** 0.5

    out, attn, mask_i8 = sparse_attn_fc_ln(
        qh, kh, vh, enc_input, w_fc_heads, params["ln_g"], params["ln_b"],
        top_k=top_k_eff, scale=scale, eps=1e-6)

    return out, attn, mask_i8.astype(jnp.bool_)


# ----------------------------------------------------------------------------
if __name__ == "__main__":
    B, L, d_model = 2, 8, 32
    n_head, d_k, d_v, top_k = 4, 8, 8, 3

    key = jax.random.PRNGKey(0)
    kx, kq, kk, kv, kf = jax.random.split(key, 5)

    x = jax.random.normal(kx, (B, L, d_model), jnp.float32)

    # deterministic parameter init (PyTorch Linear weight layout: [out, in])
    params = {
        "w_qs": jax.random.normal(kq, (n_head * d_k, d_model), jnp.float32) / jnp.sqrt(d_model),
        "w_ks": jax.random.normal(kk, (n_head * d_k, d_model), jnp.float32) / jnp.sqrt(d_model),
        "w_vs": jax.random.normal(kv, (n_head * d_v, d_model), jnp.float32) / jnp.sqrt(d_model),
        "w_fc": jax.random.normal(kf, (d_model, n_head * d_v), jnp.float32) / jnp.sqrt(n_head * d_v),
        "ln_g": jnp.ones((d_model,), jnp.float32),
        "ln_b": jnp.zeros((d_model,), jnp.float32),
    }

    enc_output, enc_slf_attn, mask_k = encoder_layer_forward(
        x, params, n_head=n_head, d_k=d_k, d_v=d_v, top_k=top_k)

    jax.block_until_ready((enc_output, enc_slf_attn, mask_k))

    assert enc_output.shape == (B, L, d_model)
    assert enc_slf_attn.shape == (B, n_head, L, L)
    assert mask_k.shape == (B, n_head, L, L)
    # each attention row keeps >= top_k entries unmasked (ties kept, like torch lt)
    assert bool(jnp.all(jnp.sum(~mask_k, axis=-1) >= min(top_k, d_k, L)))
    print("KERNEL_OK")
</pallas_src>

<mosaic_0001>
module attributes {stable_mosaic.version = 11 : i64} {
  func.func @_qkv_proj_kernel(%arg0: i32, %arg1: memref<16x32xf32, #tpu.memory_space<vmem>>, %arg2: memref<96x32xbf16, #tpu.memory_space<vmem>>, %arg3: memref<4x16x8xbf16, #tpu.memory_space<vmem>>, %arg4: memref<4x16x8xbf16, #tpu.memory_space<vmem>>, %arg5: memref<4x16x8xbf16, #tpu.memory_space<vmem>>) attributes {dimension_semantics = [#tpu.dimension_semantics<parallel>], iteration_bounds = array<i64: 1>, scalar_prefetch = 0 : i64, scratch_operands = 0 : i64, tpu.core_type = #tpu.core_type<tc>, window_params = [{transform_indices = @transform_0, window_bounds = array<i64: 16, 32>}, {pipeline_mode = #tpu.pipeline_mode<synchronous>, transform_indices = @transform_1, window_bounds = array<i64: 96, 32>}, {transform_indices = @transform_2, window_bounds = array<i64: 4, 16, 8>}, {transform_indices = @transform_3, window_bounds = array<i64: 4, 16, 8>}, {transform_indices = @transform_4, window_bounds = array<i64: 4, 16, 8>}]} {
    %c0 = arith.constant 0 : index
    %c0_0 = arith.constant 0 : index
    %0 = vector.load %arg1[%c0, %c0_0] : memref<16x32xf32, #tpu.memory_space<vmem>>, vector<16x32xf32>
    %1 = arith.truncf %0 : vector<16x32xf32> to vector<16x32xbf16>
    %c0_1 = arith.constant 0 : index
    %c0_2 = arith.constant 0 : index
    %2 = vector.load %arg2[%c0_1, %c0_2] : memref<96x32xbf16, #tpu.memory_space<vmem>>, vector<96x32xbf16>
    %cst = arith.constant dense<0.000000e+00> : vector<16x96xf32>
    %3 = tpu.matmul %1, %2, %cst {dimension_numbers = #tpu.dot_dimension_numbers<[1], [1], [0], [0], [0, 0, 1, 0], [], []>} : vector<16x32xbf16>, vector<96x32xbf16>, vector<16x96xf32> -> vector<16x96xf32>
    %4 = vector.extract_strided_slice %3 {offsets = [0, 0], sizes = [16, 8], strides = [1, 1]} : vector<16x96xf32> to vector<16x8xf32>
    %5 = arith.truncf %4 : vector<16x8xf32> to vector<16x8xbf16>
    %c0_3 = arith.constant 0 : index
    %c0_4 = arith.constant 0 : index
    %c0_5 = arith.constant 0 : index
    %6 = vector.load %arg3[%c0_3, %c0_4, %c0_5] : memref<4x16x8xbf16, #tpu.memory_space<vmem>>, vector<1x16x8xbf16>
    %7 = vector.shape_cast %6 : vector<1x16x8xbf16> to vector<16x8xbf16>
    %8 = vector.shape_cast %5 : vector<16x8xbf16> to vector<1x16x8xbf16>
    tpu.vector_store %arg3[%c0_3, %c0_4, %c0_5], %8 {strides = array<i32>} : memref<4x16x8xbf16, #tpu.memory_space<vmem>>, vector<1x16x8xbf16>,
    %9 = vector.extract_strided_slice %3 {offsets = [0, 32], sizes = [16, 8], strides = [1, 1]} : vector<16x96xf32> to vector<16x8xf32>
    %10 = arith.truncf %9 : vector<16x8xf32> to vector<16x8xbf16>
    %c0_6 = arith.constant 0 : index
    %c0_7 = arith.constant 0 : index
    %c0_8 = arith.constant 0 : index
    %11 = vector.load %arg4[%c0_6, %c0_7, %c0_8] : memref<4x16x8xbf16, #tpu.memory_space<vmem>>, vector<1x16x8xbf16>
    %12 = vector.shape_cast %11 : vector<1x16x8xbf16> to vector<16x8xbf16>
    %13 = vector.shape_cast %10 : vector<16x8xbf16> to vector<1x16x8xbf16>
    tpu.vector_store %arg4[%c0_6, %c0_7, %c0_8], %13 {strides = array<i32>} : memref<4x16x8xbf16, #tpu.memory_space<vmem>>, vector<1x16x8xbf16>,
    %14 = vector.extract_strided_slice %3 {offsets = [0, 64], sizes = [16, 8], strides = [1, 1]} : vector<16x96xf32> to vector<16x8xf32>
    %15 = arith.truncf %14 : vector<16x8xf32> to vector<16x8xbf16>
    %c0_9 = arith.constant 0 : index
    %c0_10 = arith.constant 0 : index
    %c0_11 = arith.constant 0 : index
    %16 = vector.load %arg5[%c0_9, %c0_10, %c0_11] : memref<4x16x8xbf16, #tpu.memory_space<vmem>>, vector<1x16x8xbf16>
    %17 = vector.shape_cast %16 : vector<1x16x8xbf16> to vector<16x8xbf16>
    %18 = vector.shape_cast %15 : vector<16x8xbf16> to vector<1x16x8xbf16>
    tpu.vector_store %arg5[%c0_9, %c0_10, %c0_11], %18 {strides = array<i32>} : memref<4x16x8xbf16, #tpu.memory_space<vmem>>, vector<1x16x8xbf16>,
    %19 = vector.extract_strided_slice %3 {offsets = [0, 8], sizes = [16, 8], strides = [1, 1]} : vector<16x96xf32> to vector<16x8xf32>
    %20 = arith.truncf %19 : vector<16x8xf32> to vector<16x8xbf16>
    %c1 = arith.constant 1 : index
    %c0_12 = arith.constant 0 : index
    %c0_13 = arith.constant 0 : index
    %21 = vector.load %arg3[%c1, %c0_12, %c0_13] : memref<4x16x8xbf16, #tpu.memory_space<vmem>>, vector<1x16x8xbf16>
    %22 = vector.shape_cast %21 : vector<1x16x8xbf16> to vector<16x8xbf16>
    %23 = vector.shape_cast %20 : vector<16x8xbf16> to vector<1x16x8xbf16>
    tpu.vector_store %arg3[%c1, %c0_12, %c0_13], %23 {strides = array<i32>} : memref<4x16x8xbf16, #tpu.memory_space<vmem>>, vector<1x16x8xbf16>,
    %24 = vector.extract_strided_slice %3 {offsets = [0, 40], sizes = [16, 8], strides = [1, 1]} : vector<16x96xf32> to vector<16x8xf32>
    %25 = arith.truncf %24 : vector<16x8xf32> to vector<16x8xbf16>
    %c1_14 = arith.constant 1 : index
    %c0_15 = arith.constant 0 : index
    %c0_16 = arith.constant 0 : index
    %26 = vector.load %arg4[%c1_14, %c0_15, %c0_16] : memref<4x16x8xbf16, #tpu.memory_space<vmem>>, vector<1x16x8xbf16>
    %27 = vector.shape_cast %26 : vector<1x16x8xbf16> to vector<16x8xbf16>
    %28 = vector.shape_cast %25 : vector<16x8xbf16> to vector<1x16x8xbf16>
    tpu.vector_store %arg4[%c1_14, %c0_15, %c0_16], %28 {strides = array<i32>} : memref<4x16x8xbf16, #tpu.memory_space<vmem>>, vector<1x16x8xbf16>,
    %29 = vector.extract_strided_slice %3 {offsets = [0, 72], sizes = [16, 8], strides = [1, 1]} : vector<16x96xf32> to vector<16x8xf32>
    %30 = arith.truncf %29 : vector<16x8xf32> to vector<16x8xbf16>
    %c1_17 = arith.constant 1 : index
    %c0_18 = arith.constant 0 : index
    %c0_19 = arith.constant 0 : index
    %31 = vector.load %arg5[%c1_17, %c0_18, %c0_19] : memref<4x16x8xbf16, #tpu.memory_space<vmem>>, vector<1x16x8xbf16>
    %32 = vector.shape_cast %31 : vector<1x16x8xbf16> to vector<16x8xbf16>
    %33 = vector.shape_cast %30 : vector<16x8xbf16> to vector<1x16x8xbf16>
    tpu.vector_store %arg5[%c1_17, %c0_18, %c0_19], %33 {strides = array<i32>} : memref<4x16x8xbf16, #tpu.memory_space<vmem>>, vector<1x16x8xbf16>,
    %34 = vector.extract_strided_slice %3 {offsets = [0, 16], sizes = [16, 8], strides = [1, 1]} : vector<16x96xf32> to vector<16x8xf32>
    %35 = arith.truncf %34 : vector<16x8xf32> to vector<16x8xbf16>
    %c2 = arith.constant 2 : index
    %c0_20 = arith.constant 0 : index
    %c0_21 = arith.constant 0 : index
    %36 = vector.load %arg3[%c2, %c0_20, %c0_21] : memref<4x16x8xbf16, #tpu.memory_space<vmem>>, vector<1x16x8xbf16>
    %37 = vector.shape_cast %36 : vector<1x16x8xbf16> to vector<16x8xbf16>
    %38 = vector.shape_cast %35 : vector<16x8xbf16> to vector<1x16x8xbf16>
    tpu.vector_store %arg3[%c2, %c0_20, %c0_21], %38 {strides = array<i32>} : memref<4x16x8xbf16, #tpu.memory_space<vmem>>, vector<1x16x8xbf16>,
    %39 = vector.extract_strided_slice %3 {offsets = [0, 48], sizes = [16, 8], strides = [1, 1]} : vector<16x96xf32> to vector<16x8xf32>
    %40 = arith.truncf %39 : vector<16x8xf32> to vector<16x8xbf16>
    %c2_22 = arith.constant 2 : index
    %c0_23 = arith.constant 0 : index
    %c0_24 = arith.constant 0 : index
    %41 = vector.load %arg4[%c2_22, %c0_23, %c0_24] : memref<4x16x8xbf16, #tpu.memory_space<vmem>>, vector<1x16x8xbf16>
    %42 = vector.shape_cast %41 : vector<1x16x8xbf16> to vector<16x8xbf16>
    %43 = vector.shape_cast %40 : vector<16x8xbf16> to vector<1x16x8xbf16>
    tpu.vector_store %arg4[%c2_22, %c0_23, %c0_24], %43 {strides = array<i32>} : memref<4x16x8xbf16, #tpu.memory_space<vmem>>, vector<1x16x8xbf16>,
    %44 = vector.extract_strided_slice %3 {offsets = [0, 80], sizes = [16, 8], strides = [1, 1]} : vector<16x96xf32> to vector<16x8xf32>
    %45 = arith.truncf %44 : vector<16x8xf32> to vector<16x8xbf16>
    %c2_25 = arith.constant 2 : index
    %c0_26 = arith.constant 0 : index
    %c0_27 = arith.constant 0 : index
    %46 = vector.load %arg5[%c2_25, %c0_26, %c0_27] : memref<4x16x8xbf16, #tpu.memory_space<vmem>>, vector<1x16x8xbf16>
    %47 = vector.shape_cast %46 : vector<1x16x8xbf16> to vector<16x8xbf16>
    %48 = vector.shape_cast %45 : vector<16x8xbf16> to vector<1x16x8xbf16>
    tpu.vector_store %arg5[%c2_25, %c0_26, %c0_27], %48 {strides = array<i32>} : memref<4x16x8xbf16, #tpu.memory_space<vmem>>, vector<1x16x8xbf16>,
    %49 = vector.extract_strided_slice %3 {offsets = [0, 24], sizes = [16, 8], strides = [1, 1]} : vector<16x96xf32> to vector<16x8xf32>
    %50 = arith.truncf %49 : vector<16x8xf32> to vector<16x8xbf16>
    %c3 = arith.constant 3 : index
    %c0_28 = arith.constant 0 : index
    %c0_29 = arith.constant 0 : index
    %51 = vector.load %arg3[%c3, %c0_28, %c0_29] : memref<4x16x8xbf16, #tpu.memory_space<vmem>>, vector<1x16x8xbf16>
    %52 = vector.shape_cast %51 : vector<1x16x8xbf16> to vector<16x8xbf16>
    %53 = vector.shape_cast %50 : vector<16x8xbf16> to vector<1x16x8xbf16>
    tpu.vector_store %arg3[%c3, %c0_28, %c0_29], %53 {strides = array<i32>} : memref<4x16x8xbf16, #tpu.memory_space<vmem>>, vector<1x16x8xbf16>,
    %54 = vector.extract_strided_slice %3 {offsets = [0, 56], sizes = [16, 8], strides = [1, 1]} : vector<16x96xf32> to vector<16x8xf32>
    %55 = arith.truncf %54 : vector<16x8xf32> to vector<16x8xbf16>
    %c3_30 = arith.constant 3 : index
    %c0_31 = arith.constant 0 : index
    %c0_32 = arith.constant 0 : index
    %56 = vector.load %arg4[%c3_30, %c0_31, %c0_32] : memref<4x16x8xbf16, #tpu.memory_space<vmem>>, vector<1x16x8xbf16>
    %57 = vector.shape_cast %56 : vector<1x16x8xbf16> to vector<16x8xbf16>
    %58 = vector.shape_cast %55 : vector<16x8xbf16> to vector<1x16x8xbf16>
    tpu.vector_store %arg4[%c3_30, %c0_31, %c0_32], %58 {strides = array<i32>} : memref<4x16x8xbf16, #tpu.memory_space<vmem>>, vector<1x16x8xbf16>,
    %59 = vector.extract_strided_slice %3 {offsets = [0, 88], sizes = [16, 8], strides = [1, 1]} : vector<16x96xf32> to vector<16x8xf32>
    %60 = arith.truncf %59 : vector<16x8xf32> to vector<16x8xbf16>
    %c3_33 = arith.constant 3 : index
    %c0_34 = arith.constant 0 : index
    %c0_35 = arith.constant 0 : index
    %61 = vector.load %arg5[%c3_33, %c0_34, %c0_35] : memref<4x16x8xbf16, #tpu.memory_space<vmem>>, vector<1x16x8xbf16>
    %62 = vector.shape_cast %61 : vector<1x16x8xbf16> to vector<16x8xbf16>
    %63 = vector.shape_cast %60 : vector<16x8xbf16> to vector<1x16x8xbf16>
    tpu.vector_store %arg5[%c3_33, %c0_34, %c0_35], %63 {strides = array<i32>} : memref<4x16x8xbf16, #tpu.memory_space<vmem>>, vector<1x16x8xbf16>,
    return
  }
  func.func @transform_0(%arg0: i32) -> (i32, i32) {
    %c0_i32 = arith.constant 0 : i32
    %c0_i32_0 = arith.constant 0 : i32
    return %arg0, %c0_i32 : i32, i32
  }
  func.func @transform_1(%arg0: i32) -> (i32, i32) {
    %c0_i32 = arith.constant 0 : i32
    %c0_i32_0 = arith.constant 0 : i32
    %c0_i32_1 = arith.constant 0 : i32
    return %c0_i32, %c0_i32_0 : i32, i32
  }
  func.func @transform_2(%arg0: i32) -> (i32, i32, i32) {
    %c0_i32 = arith.constant 0 : i32
    %c0_i32_0 = arith.constant 0 : i32
    %c0_i32_1 = arith.constant 0 : i32
    return %c0_i32, %arg0, %c0_i32_0 : i32, i32, i32
  }
  func.func @transform_3(%arg0: i32) -> (i32, i32, i32) {
    %c0_i32 = arith.constant 0 : i32
    %c0_i32_0 = arith.constant 0 : i32
    %c0_i32_1 = arith.constant 0 : i32
    return %c0_i32, %arg0, %c0_i32_0 : i32, i32, i32
  }
  func.func @transform_4(%arg0: i32) -> (i32, i32, i32) {
    %c0_i32 = arith.constant 0 : i32
    %c0_i32_0 = arith.constant 0 : i32
    %c0_i32_1 = arith.constant 0 : i32
    return %c0_i32, %arg0, %c0_i32_0 : i32, i32, i32
  }
}

</mosaic_0001>

<bundles_post_ra>
// kernel: tpu_custom_call.1
= control target key start
LH: loop header
LB: loop body
LE: loop exit
PB: predicated region body
PF: predicated region fallthrough
CT: control target
= control target key end

     0   :  { %vm60_vm0 = vcmask 261120   ;;  %v314_v0 = vmov 0.0   ;;  %vm315_vm1 = vmmov 0   ;;  %vm131_vm2 = vcmask 60416   ;;  %s317_s5 = smov 96   ;;  %s318_s9 = smov 120   ;;  %s481_s1 = inlined_call_operand.vmem [shape: bf16[96,32], index: 1, kind: input, shape index: {}]   ;;  %s482_s0 = inlined_call_operand.vmem [shape: f32[16,32], index: 0, kind: input, shape index: {}]   ;;  %s483_s2 = inlined_call_operand.vmem [shape: bf16[4,16,8], index: 2, kind: output, shape index: {0}]   ;;  %s484_s4 = inlined_call_operand.vmem [shape: bf16[4,16,8], index: 4, kind: output, shape index: {2}]   ;;  %s485_s3 = inlined_call_operand.vmem [shape: bf16[4,16,8], index: 3, kind: output, shape index: {1}]  }
   0x1   :  { %279 = vmatprep.subr.bf16.mxu0 %v314_v0  ;;  %v308_v1 = vld [vmem:[%s481_s1] sm:$0xff]   ;;  %291 = vmatprep.mubr.msk.bf16.mxu0 %vm315_vm1, %v314_v0  ;;  %v309_v3 = vld [vmem:[%s481_s1 + $0x8] sm:$0xff]   ;;  %v310_v5 = vld [vmem:[%s481_s1 + $0x10] sm:$0xff]   ;;  %s319_s10 = smov 88   ;;  %s320_s11 = smov 56  }
   0x2   :  { %v65_v2 = vsel %vm60_vm0, %v308_v1, 0  ;;  %v68_v4 = vsel %vm60_vm0, %v309_v3, 0  ;;  %v71_v6 = vsel %vm60_vm0, %v310_v5, 0  ;;  %v311_v7 = vld [vmem:[%s481_s1 + $0x18] sm:$0xff]   ;;  %v312_v9 = vld [vmem:[%s481_s1 + $0x20] sm:$0xff]   ;;  %v313_v11 = vld [vmem:[%s481_s1 + $0x28] sm:$0xff]  }
   0x3   :  { %280 = vmatpush3.bf16.xpose.msra.mxu0 %v65_v2  ;;  %v74_v8 = vsel %vm60_vm0, %v311_v7, 0  ;;  %v77_v10 = vsel %vm60_vm0, %v312_v9, 0  ;;  %v80_v12 = vsel %vm60_vm0, %v313_v11, 0  ;;  %v15_v13 = vld [vmem:[%s482_s0] sm:$0xff]  ;;  %v16_v14 = vld [vmem:[%s482_s0 + $0x8] sm:$0xff]  ;;  %s316_s1 = smov 64  }
   0x4   :  { %281 = vmatprep.subr.bf16.mxu0 %v314_v0  ;;  %v17_v15 = vpack.c.bf16 %v16_v14, %v15_v13  ;;  %s321_s12 = smov 112   ;;  %s322_s13 = smov 80  }
   0x5   :  { %s323_s14 = smov 48   ;;  %s324_s15 = smov 104  }
   0x6   :  { %s325_s16 = smov 72   ;;  %s326_s17 = smov 40  }
   0xb   :  { %282 = vmatpush3.bf16.xpose.msra.mxu0 %v68_v4 }
   0xc   :  { %283 = vmatprep.subr.bf16.mxu0 %v314_v0 }
  0x13   :  { %284 = vmatpush3.bf16.xpose.msra.mxu0 %v71_v6 }
  0x14   :  { %285 = vmatprep.subr.bf16.mxu0 %v314_v0 }
  0x1b   :  { %286 = vmatpush3.bf16.xpose.msra.mxu0 %v74_v8 }
  0x1c   :  { %287 = vmatprep.subr.bf16.mxu0 %v314_v0 }
  0x23   :  { %288 = vmatpush3.bf16.xpose.msra.mxu0 %v77_v10 }
  0x24   :  { %289 = vmatprep.subr.bf16.mxu0 %v314_v0 }
  0x2b   :  { %290 = vmatpush3.bf16.xpose.msra.mxu0 %v80_v12 }
  0x32   :  { %292 = vmatmul.mubr.msk.bf16.vlgmr.msra.gmra.mrb[0].mxu0 %vm60_vm0, %v17_v15 }
 0x105   :  { %v116_v16 = vpop.f32.mrb[0].mxu0 }
 0x106   :  { %v270_v17 = vpack.c.bf16 %v116_v16, %v116_v16  ;;  %v293_v18 = vpop.f32.mrb[1].mxu0 }
 0x107   :  { %v119_v19 = vpop.f32.mrb[2].mxu0 }
 0x108   :  { %v271_v20 = vpack.c.bf16 %v119_v19, %v119_v19  ;;  %142 = vrot.lane.b32.xlu1 %v270_v17, %s316_s1  ;;  %134 = vrot.lane.b32.xlu0 %v270_v17, %s317_s5  ;;  %v294_v21 = vpop.f32.mrb[3].mxu0  ;;  %132 = vst.msk [vmem:[%s483_s2] sm:$0xf] %vm131_vm2, %v270_v17 }
 0x10a   :  { %133 = vst.msk [vmem:[%s483_s2 + $0x4] sm:$0xf] %vm131_vm2, %v271_v20 }
 0x10c   :  { %150 = vrot.lane.b32.xlu0 %v270_v17, %s318_s9  ;;  %144 = vrot.lane.b32.xlu1 %v271_v20, %s316_s1 }
 0x110   :  { %159 = vrot.lane.b32.xlu0 %v270_v17, %s319_s10  ;;  %152 = vrot.lane.b32.xlu1 %v271_v20, %s318_s9 }
 0x114   :  { %168 = vrot.lane.b32.xlu0 %v270_v17, %s320_s11  ;;  %161 = vrot.lane.b32.xlu1 %v271_v20, %s319_s10 }
 0x118   :  { %177 = vrot.lane.b32.xlu0 %v270_v17, %s321_s12  ;;  %170 = vrot.lane.b32.xlu1 %v271_v20, %s320_s11 }
 0x11c   :  { %186 = vrot.lane.b32.xlu0 %v270_v17, %s322_s13  ;;  %179 = vrot.lane.b32.xlu1 %v271_v20, %s321_s12 }
 0x120   :  { %195 = vrot.lane.b32.xlu0 %v270_v17, %s323_s14  ;;  %188 = vrot.lane.b32.xlu1 %v271_v20, %s322_s13 }
 0x124   :  { %204 = vrot.lane.b32.xlu0 %v270_v17, %s324_s15  ;;  %197 = vrot.lane.b32.xlu1 %v271_v20, %s323_s14 }
 0x128   :  { %213 = vrot.lane.b32.xlu0 %v270_v17, %s325_s16  ;;  %206 = vrot.lane.b32.xlu1 %v271_v20, %s324_s15 }
 0x12c   :  { %215 = vrot.lane.b32.xlu1 %v271_v20, %s325_s16  ;;  %136 = vrot.lane.b32.xlu0 %v271_v20, %s317_s5 }
 0x130   :  { %224 = vrot.lane.b32.xlu1 %v271_v20, %s326_s17  ;;  %222 = vrot.lane.b32.xlu0 %v270_v17, %s326_s17 }
 0x17a   :  { %v143_v22 = vpop.permute.xlu1 %142  ;;  %v135_v23 = vpop.permute.xlu0 %134 }
 0x17b   :  { %148 = vst.msk [vmem:[%s484_s4] sm:$0xf] %vm131_vm2, %v143_v22  ;;  %140 = vst.msk [vmem:[%s485_s3] sm:$0xf] %vm131_vm2, %v135_v23 }
 0x17e   :  { %v151_v24 = vpop.permute.xlu0 %150  ;;  %v145_v25 = vpop.permute.xlu1 %144 }
 0x17f   :  { %252 = vst.msk [vmem:[%s483_s2 + $0x8] sm:$0xf] %vm131_vm2, %v151_v24  ;;  %149 = vst.msk [vmem:[%s484_s4 + $0x4] sm:$0xf] %vm131_vm2, %v145_v25 }
 0x182   :  { %v160_v26 = vpop.permute.xlu0 %159  ;;  %v153_v27 = vpop.permute.xlu1 %152 }
 0x183   :  { %254 = vst.msk [vmem:[%s485_s3 + $0x8] sm:$0xf] %vm131_vm2, %v160_v26  ;;  %253 = vst.msk [vmem:[%s483_s2 + $0xc] sm:$0xf] %vm131_vm2, %v153_v27 }
 0x186   :  { %v169_v28 = vpop.permute.xlu0 %168  ;;  %v162_v29 = vpop.permute.xlu1 %161 }
 0x187   :  { %256 = vst.msk [vmem:[%s484_s4 + $0x8] sm:$0xf] %vm131_vm2, %v169_v28  ;;  %255 = vst.msk [vmem:[%s485_s3 + $0xc] sm:$0xf] %vm131_vm2, %v162_v29 }
 0x18a   :  { %v178_v30 = vpop.permute.xlu0 %177  ;;  %v171_v31 = vpop.permute.xlu1 %170 }
 0x18b   :  { %258 = vst.msk [vmem:[%s483_s2 + $0x10] sm:$0xf] %vm131_vm2, %v178_v30  ;;  %257 = vst.msk [vmem:[%s484_s4 + $0xc] sm:$0xf] %vm131_vm2, %v171_v31 }
 0x18e   :  { %v187_v32 = vpop.permute.xlu0 %186  ;;  %v180_v33 = vpop.permute.xlu1 %179 }
 0x18f   :  { %260 = vst.msk [vmem:[%s485_s3 + $0x10] sm:$0xf] %vm131_vm2, %v187_v32  ;;  %259 = vst.msk [vmem:[%s483_s2 + $0x14] sm:$0xf] %vm131_vm2, %v180_v33 }
 0x192   :  { %v196_v34 = vpop.permute.xlu0 %195  ;;  %v189_v35 = vpop.permute.xlu1 %188 }
 0x193   :  { %262 = vst.msk [vmem:[%s484_s4 + $0x10] sm:$0xf] %vm131_vm2, %v196_v34  ;;  %261 = vst.msk [vmem:[%s485_s3 + $0x14] sm:$0xf] %vm131_vm2, %v189_v35 }
 0x196   :  { %v205_v36 = vpop.permute.xlu0 %204  ;;  %v198_v37 = vpop.permute.xlu1 %197 }
 0x197   :  { %264 = vst.msk [vmem:[%s483_s2 + $0x18] sm:$0xf] %vm131_vm2, %v205_v36  ;;  %263 = vst.msk [vmem:[%s484_s4 + $0x14] sm:$0xf] %vm131_vm2, %v198_v37 }
 0x19a   :  { %v214_v38 = vpop.permute.xlu0 %213  ;;  %v207_v39 = vpop.permute.xlu1 %206 }
 0x19b   :  { %266 = vst.msk [vmem:[%s485_s3 + $0x18] sm:$0xf] %vm131_vm2, %v214_v38  ;;  %265 = vst.msk [vmem:[%s483_s2 + $0x1c] sm:$0xf] %vm131_vm2, %v207_v39 }
 0x19e   :  { %v216_v40 = vpop.permute.xlu1 %215  ;;  %v137_v41 = vpop.permute.xlu0 %136 }
 0x19f   :  { %267 = vst.msk [vmem:[%s485_s3 + $0x1c] sm:$0xf] %vm131_vm2, %v216_v40  ;;  %141 = vst.msk [vmem:[%s485_s3 + $0x4] sm:$0xf] %vm131_vm2, %v137_v41 }
 0x1a2   :  { %v225_v42 = vpop.permute.xlu1 %224  ;;  %v223_v43 = vpop.permute.xlu0 %222 }
 0x1a3   :  { %269 = vst.msk [vmem:[%s484_s4 + $0x1c] sm:$0xf] %vm131_vm2, %v225_v42  ;;  %268 = vst.msk [vmem:[%s484_s4 + $0x18] sm:$0xf] %vm131_vm2, %v223_v43 }

</bundles_post_ra>
